<compile_context>
chip_gen: v6e
topology: v6e:2x2x1
jax: 0.10.0
libtpu: 0.0.40
codegen_flags: <defaults>
</compile_context>

<pallas_src>
import jax
import jax.numpy as jnp
from jax.experimental import pallas as pl
from jax.experimental.pallas import tpu as pltpu

# Logical (PyTorch) sizes.
IN_DIM = 2
HID_DIM = 100
OUT_DIM = 2

# Padded (TPU-friendly) sizes.
H = 128        # hidden, padded from 100 to the vreg/MXU-native width
FP = 8         # in/out features, padded from 2 to the sublane width
TILE_CAP = 4096  # max batch lanes per tile (~5 MiB working set, VMEM-safe everywhere)


def _round_up(x, m):
    return ((x + m - 1) // m) * m


def _choose_tiling(B):
    """Pick (tile_b, b_pad) for a logical batch B."""
    B = max(int(B), 1)
    if B <= 128:
        tile_b = 128                                    # single minimal tile
    elif B <= 2 * TILE_CAP:
        # Exactly two tiles so the "parallel" batch axis shards across both
        # v7x TensorCores (v5e/v6e simply run the two tiles back-to-back).
        tile_b = _round_up(-(-B // 2), 128)
    else:
        tile_b = TILE_CAP
    b_pad = _round_up(B, tile_b)
    return tile_b, b_pad


def _tile_lanes(b_pad):
    """Pick tile_b for an already-padded batch axis (multiple of 128)."""
    assert b_pad % 128 == 0 and b_pad > 0
    n = b_pad // 128
    if n == 1:
        return 128
    cap = min(TILE_CAP // 128, n // 2)   # >= 2 grid steps when possible (v7x)
    u = max(d for d in range(1, cap + 1) if n % d == 0)
    return 128 * u


def _odefunc_kernel(y_ref, w1_ref, b1_ref, w2_ref, b2_ref, w3_ref, b3_ref, o_ref):
    # y_ref : (FP, tile_b)   -- rows 0,1 hold the 2 input features, rest zero
    # w1_ref: (H, FP)  b1_ref: (H, 1)
    # w2_ref: (H, H)   b2_ref: (H, 1)
    # w3_ref: (FP, H)  b3_ref: (FP, 1)
    # o_ref : (FP, tile_b)   -- rows 0,1 are the 2 outputs, rows 2..7 exactly 0
    y = y_ref[...]

    # Layer 1 on the (otherwise idle) MXU: a single K=8 pass replaces the
    # VPU lane-broadcast FMAs.  Padded rows of w1/b1 are zero -> padded
    # hidden rows stay exactly zero through tanh.
    h1 = jnp.tanh(
        jnp.dot(w1_ref[...], y, preferred_element_type=jnp.float32) + b1_ref[...]
    )

    # Layer 2: native 128x128 MXU tile, f32 accumulation.
    h2 = jnp.tanh(
        jnp.dot(w2_ref[...], h1, preferred_element_type=jnp.float32) + b2_ref[...]
    )

    # Layer 3: (8,128)@(128,tile_b) -> lane-dense (8,tile_b) output.
    out = jnp.dot(w3_ref[...], h2, preferred_element_type=jnp.float32) + b3_ref[...]
    o_ref[...] = out.astype(o_ref.dtype)


def prepare_params(params):
    """Pad + lay out PyTorch-layout params once (outside the hot loop).

    params: (w1 (100,2), b1 (100,), w2 (100,100), b2 (100,), w3 (2,100), b3 (2,))
    returns padded: w1 (H,FP), b1 (H,1), w2 (H,H), b2 (H,1), w3 (FP,H), b3 (FP,1)
    """
    w1, b1, w2, b2, w3, b3 = params
    f32 = jnp.float32
    w1p = jnp.zeros((H, FP), f32).at[:HID_DIM, :IN_DIM].set(w1.astype(f32))
    b1p = jnp.zeros((H, 1), f32).at[:HID_DIM, 0].set(b1.astype(f32))
    w2p = jnp.zeros((H, H), f32).at[:HID_DIM, :HID_DIM].set(w2.astype(f32))
    b2p = jnp.zeros((H, 1), f32).at[:HID_DIM, 0].set(b2.astype(f32))
    w3p = jnp.zeros((FP, H), f32).at[:OUT_DIM, :HID_DIM].set(w3.astype(f32))
    b3p = jnp.zeros((FP, 1), f32).at[:OUT_DIM, 0].set(b3.astype(f32))
    return (w1p, b1p, w2p, b2p, w3p, b3p)


def pad_state(y, b_pad=None):
    """(B, 2) -> (FP, b_pad) transposed/zero-padded state.  Pay once per trajectory."""
    B = y.shape[0]
    if b_pad is None:
        _, b_pad = _choose_tiling(B)
    return jnp.zeros((FP, b_pad), jnp.float32).at[:IN_DIM, :B].set(
        y.astype(jnp.float32).T
    )


def unpad_state(yT, B):
    """(FP, b_pad) padded state -> (B, 2)."""
    return yT[:OUT_DIM, :B].T


def odefunc_forward_padded(t, yT, prepared_params, *, tile_b=None):
    """f-eval on state already in the (FP, b_pad) padded layout.

    yT: (FP, b_pad) float32 with b_pad a multiple of 128 (see pad_state()).
    Returns (FP, b_pad) float32; rows 2..7 and padded batch columns' rows 2..7
    are exactly zero, so the result can be fed straight back in (RK stages).
    `t` is ignored, exactly as in the PyTorch module.
    """
    del t  # unused by the network
    w1p, b1p, w2p, b2p, w3p, b3p = prepared_params
    fp, b_pad = yT.shape
    assert fp == FP and b_pad % 128 == 0
    if tile_b is None:
        tile_b = _tile_lanes(b_pad)
    assert b_pad % tile_b == 0

    const = lambda shape: pl.BlockSpec(shape, lambda i: (0, 0))  # VMEM-resident

    return pl.pallas_call(
        _odefunc_kernel,
        out_shape=jax.ShapeDtypeStruct((FP, b_pad), jnp.float32),
        grid=(b_pad // tile_b,),
        in_specs=[
            pl.BlockSpec((FP, tile_b), lambda i: (0, i)),  # activations stream
            const(w1p.shape),
            const(b1p.shape),
            const(w2p.shape),
            const(b2p.shape),
            const(w3p.shape),
            const(b3p.shape),
        ],
        out_specs=pl.BlockSpec((FP, tile_b), lambda i: (0, i)),
        compiler_params=pltpu.CompilerParams(
            dimension_semantics=("parallel",),  # batch tiles across TCs on v7x
        ),
    )(yT.astype(jnp.float32), w1p, b1p, w2p, b2p, w3p, b3p)


def odefunc_forward(t, y, prepared_params):
    """Compatibility wrapper with PyTorch-shaped I/O: (B, 2) -> (B, 2).

    Pays the pad/transpose per call; ODE-solver loops should use
    pad_state() + odefunc_forward_padded() + unpad_state() instead.
    """
    B = y.shape[0]
    tile_b, b_pad = _choose_tiling(B)
    yT = pad_state(y, b_pad)
    outT = odefunc_forward_padded(t, yT, prepared_params, tile_b=tile_b)
    return unpad_state(outT, B)


def init_params(key):
    """Deterministic init matching the PyTorch module:
    weights ~ Normal(0, 0.1) in torch (out, in) layout, biases = 0."""
    k1, k2, k3 = jax.random.split(key, 3)
    w1 = 0.1 * jax.random.normal(k1, (HID_DIM, IN_DIM), dtype=jnp.float32)
    b1 = jnp.zeros((HID_DIM,), dtype=jnp.float32)
    w2 = 0.1 * jax.random.normal(k2, (HID_DIM, HID_DIM), dtype=jnp.float32)
    b2 = jnp.zeros((HID_DIM,), dtype=jnp.float32)
    w3 = 0.1 * jax.random.normal(k3, (OUT_DIM, HID_DIM), dtype=jnp.float32)
    b3 = jnp.zeros((OUT_DIM,), dtype=jnp.float32)
    return (w1, b1, w2, b2, w3, b3)


def odefunc_reference(t, y, params):
    """Plain-JAX reference (PyTorch semantics: x @ W.T + b)."""
    del t
    w1, b1, w2, b2, w3, b3 = params
    h1 = jnp.tanh(y @ w1.T + b1)
    h2 = jnp.tanh(h1 @ w2.T + b2)
    return h2 @ w3.T + b3


if __name__ == "__main__":
    key = jax.random.PRNGKey(0)
    pkey, ykey = jax.random.split(key)

    params = init_params(pkey)
    prepared = prepare_params(params)  # pad once, reuse per call
    t = jnp.float32(0.0)               # unused, mirrors the PyTorch signature

    # 1) Compatibility path: small batch (grid=1) and a batch that exercises
    #    the two-tile (v7x-megacore) grid split.
    for batch in (8, 200):
        yb = jax.random.normal(
            jax.random.fold_in(ykey, batch), (batch, IN_DIM), dtype=jnp.float32
        )
        out = jax.block_until_ready(odefunc_forward(t, yb, prepared))
        ref = jax.block_until_ready(odefunc_reference(t, yb, params))
        assert out.shape == (batch, OUT_DIM)
        assert jnp.allclose(out, ref, atol=1e-5, rtol=1e-5), f"mismatch at B={batch}"

    # 2) Padded fast path: pad once, run several f-evals (as an ODE solver /
    #    RK-stage loop would), unpad once.
    batch = 8
    yb = jax.random.normal(ykey, (batch, IN_DIM), dtype=jnp.float32)
    stateT = pad_state(yb)
    ref = yb
    for _ in range(3):
        stateT = odefunc_forward_padded(t, stateT, prepared)
        ref = odefunc_reference(t, ref, params)
    out = jax.block_until_ready(unpad_state(stateT, batch))
    ref = jax.block_until_ready(ref)
    assert out.shape == (batch, OUT_DIM)
    assert jnp.allclose(out, ref, atol=1e-5, rtol=1e-5), "mismatch on padded path"

    print("KERNEL_OK")
</pallas_src>

<mosaic_0001>
module attributes {stable_mosaic.version = 11 : i64} {
  func.func @_odefunc_kernel(%arg0: i32, %arg1: memref<8x128xf32, #tpu.memory_space<vmem>>, %arg2: memref<128x8xf32, #tpu.memory_space<vmem>>, %arg3: memref<128x1xf32, #tpu.memory_space<vmem>>, %arg4: memref<128x128xf32, #tpu.memory_space<vmem>>, %arg5: memref<128x1xf32, #tpu.memory_space<vmem>>, %arg6: memref<8x128xf32, #tpu.memory_space<vmem>>, %arg7: memref<8x1xf32, #tpu.memory_space<vmem>>, %arg8: memref<8x128xf32, #tpu.memory_space<vmem>>) attributes {dimension_semantics = [#tpu.dimension_semantics<parallel>], iteration_bounds = array<i64: 1>, scalar_prefetch = 0 : i64, scratch_operands = 0 : i64, tpu.core_type = #tpu.core_type<tc>, window_params = [{transform_indices = @transform_0, window_bounds = array<i64: 8, 128>}, {pipeline_mode = #tpu.pipeline_mode<synchronous>, transform_indices = @transform_1, window_bounds = array<i64: 128, 8>}, {pipeline_mode = #tpu.pipeline_mode<synchronous>, transform_indices = @transform_2, window_bounds = array<i64: 128, 1>}, {pipeline_mode = #tpu.pipeline_mode<synchronous>, transform_indices = @transform_3, window_bounds = array<i64: 128, 128>}, {pipeline_mode = #tpu.pipeline_mode<synchronous>, transform_indices = @transform_4, window_bounds = array<i64: 128, 1>}, {pipeline_mode = #tpu.pipeline_mode<synchronous>, transform_indices = @transform_5, window_bounds = array<i64: 8, 128>}, {pipeline_mode = #tpu.pipeline_mode<synchronous>, transform_indices = @transform_6, window_bounds = array<i64: 8, 1>}, {transform_indices = @transform_7, window_bounds = array<i64: 8, 128>}]} {
    %c0 = arith.constant 0 : index
    %c0_0 = arith.constant 0 : index
    %0 = vector.load %arg1[%c0, %c0_0] : memref<8x128xf32, #tpu.memory_space<vmem>>, vector<8x128xf32>
    %c0_1 = arith.constant 0 : index
    %c0_2 = arith.constant 0 : index
    %1 = vector.load %arg2[%c0_1, %c0_2] : memref<128x8xf32, #tpu.memory_space<vmem>>, vector<128x8xf32>
    %cst = arith.constant dense<0.000000e+00> : vector<128x128xf32>
    %2 = tpu.matmul %1, %0, %cst {dimension_numbers = #tpu.dot_dimension_numbers<[1], [0], [0], [1], [0, 0, 1, 1], [], []>} : vector<128x8xf32>, vector<8x128xf32>, vector<128x128xf32> -> vector<128x128xf32>
    %c0_3 = arith.constant 0 : index
    %c0_4 = arith.constant 0 : index
    %3 = vector.load %arg3[%c0_3, %c0_4] : memref<128x1xf32, #tpu.memory_space<vmem>>, vector<128x1xf32>
    %4 = vector.broadcast %3 : vector<128x1xf32> to vector<128x128xf32>
    %5 = arith.addf %2, %4 : vector<128x128xf32>
    %6 = math.tanh %5 : vector<128x128xf32>
    %c0_5 = arith.constant 0 : index
    %c0_6 = arith.constant 0 : index
    %7 = vector.load %arg4[%c0_5, %c0_6] : memref<128x128xf32, #tpu.memory_space<vmem>>, vector<128x128xf32>
    %cst_7 = arith.constant dense<0.000000e+00> : vector<128x128xf32>
    %8 = tpu.matmul %7, %6, %cst_7 {dimension_numbers = #tpu.dot_dimension_numbers<[1], [0], [0], [1], [0, 0, 1, 1], [], []>} : vector<128x128xf32>, vector<128x128xf32>, vector<128x128xf32> -> vector<128x128xf32>
    %c0_8 = arith.constant 0 : index
    %c0_9 = arith.constant 0 : index
    %9 = vector.load %arg5[%c0_8, %c0_9] : memref<128x1xf32, #tpu.memory_space<vmem>>, vector<128x1xf32>
    %10 = vector.broadcast %9 : vector<128x1xf32> to vector<128x128xf32>
    %11 = arith.addf %8, %10 : vector<128x128xf32>
    %12 = math.tanh %11 : vector<128x128xf32>
    %c0_10 = arith.constant 0 : index
    %c0_11 = arith.constant 0 : index
    %13 = vector.load %arg6[%c0_10, %c0_11] : memref<8x128xf32, #tpu.memory_space<vmem>>, vector<8x128xf32>
    %cst_12 = arith.constant dense<0.000000e+00> : vector<8x128xf32>
    %14 = tpu.matmul %13, %12, %cst_12 {dimension_numbers = #tpu.dot_dimension_numbers<[1], [0], [0], [1], [0, 0, 1, 1], [], []>} : vector<8x128xf32>, vector<128x128xf32>, vector<8x128xf32> -> vector<8x128xf32>
    %c0_13 = arith.constant 0 : index
    %c0_14 = arith.constant 0 : index
    %15 = vector.load %arg7[%c0_13, %c0_14] : memref<8x1xf32, #tpu.memory_space<vmem>>, vector<8x1xf32>
    %16 = vector.broadcast %15 : vector<8x1xf32> to vector<8x128xf32>
    %17 = arith.addf %14, %16 : vector<8x128xf32>
    %c0_15 = arith.constant 0 : index
    %c0_16 = arith.constant 0 : index
    %18 = vector.load %arg8[%c0_15, %c0_16] : memref<8x128xf32, #tpu.memory_space<vmem>>, vector<8x128xf32>
    tpu.vector_store %arg8[%c0_15, %c0_16], %17 {strides = array<i32>} : memref<8x128xf32, #tpu.memory_space<vmem>>, vector<8x128xf32>,
    return
  }
  func.func @transform_0(%arg0: i32) -> (i32, i32) {
    %c0_i32 = arith.constant 0 : i32
    %c0_i32_0 = arith.constant 0 : i32
    return %c0_i32, %arg0 : i32, i32
  }
  func.func @transform_1(%arg0: i32) -> (i32, i32) {
    %c0_i32 = arith.constant 0 : i32
    %c0_i32_0 = arith.constant 0 : i32
    %c0_i32_1 = arith.constant 0 : i32
    return %c0_i32, %c0_i32_0 : i32, i32
  }
  func.func @transform_2(%arg0: i32) -> (i32, i32) {
    %c0_i32 = arith.constant 0 : i32
    %c0_i32_0 = arith.constant 0 : i32
    %c0_i32_1 = arith.constant 0 : i32
    return %c0_i32, %c0_i32_0 : i32, i32
  }
  func.func @transform_3(%arg0: i32) -> (i32, i32) {
    %c0_i32 = arith.constant 0 : i32
    %c0_i32_0 = arith.constant 0 : i32
    %c0_i32_1 = arith.constant 0 : i32
    return %c0_i32, %c0_i32_0 : i32, i32
  }
  func.func @transform_4(%arg0: i32) -> (i32, i32) {
    %c0_i32 = arith.constant 0 : i32
    %c0_i32_0 = arith.constant 0 : i32
    %c0_i32_1 = arith.constant 0 : i32
    return %c0_i32, %c0_i32_0 : i32, i32
  }
  func.func @transform_5(%arg0: i32) -> (i32, i32) {
    %c0_i32 = arith.constant 0 : i32
    %c0_i32_0 = arith.constant 0 : i32
    %c0_i32_1 = arith.constant 0 : i32
    return %c0_i32, %c0_i32_0 : i32, i32
  }
  func.func @transform_6(%arg0: i32) -> (i32, i32) {
    %c0_i32 = arith.constant 0 : i32
    %c0_i32_0 = arith.constant 0 : i32
    %c0_i32_1 = arith.constant 0 : i32
    return %c0_i32, %c0_i32_0 : i32, i32
  }
  func.func @transform_7(%arg0: i32) -> (i32, i32) {
    %c0_i32 = arith.constant 0 : i32
    %c0_i32_0 = arith.constant 0 : i32
    return %c0_i32, %arg0 : i32, i32
  }
}

</mosaic_0001>

<bundles_post_ra>
// kernel: tpu_custom_call.1
= control target key start
LH: loop header
LB: loop body
LE: loop exit
PB: predicated region body
PF: predicated region fallthrough
CT: control target
= control target key end

     0   :  { %vm140_vm0 = vcmask 64512   ;;  %v1006_v4 = vmov 0   ;;  %s1305_s0 = inlined_call_operand.vmem [shape: f32[8,128], index: 0, kind: input, shape index: {}]   ;;  %s1306_s1 = inlined_call_operand.vmem [shape: f32[128,8], index: 1, kind: input, shape index: {}]   ;;  %s1307_s2 = inlined_call_operand.vmem [shape: f32[128,1], index: 2, kind: input, shape index: {}]   ;;  %s1308_s3 = inlined_call_operand.vmem [shape: f32[128,128], index: 3, kind: input, shape index: {}]   ;;  %s1309_s4 = inlined_call_operand.vmem [shape: f32[128,1], index: 4, kind: input, shape index: {}]   ;;  %s1310_s5 = inlined_call_operand.vmem [shape: f32[8,128], index: 5, kind: input, shape index: {}]   ;;  %s1311_s6 = inlined_call_operand.vmem [shape: f32[8,1], index: 6, kind: input, shape index: {}]   ;;  %s1312_s7 = inlined_call_operand.hbm [shape: f32[8,128], index: 7, kind: output, shape index: {}]  }
   0x1   :  { %v27_v0 = vld [vmem:[%s1305_s0] sm:$0xff]  ;;  %v29_v2 = vld [vmem:[%s1306_s1 + $0x8] sm:$0xff]  ;;  %v30_v3 = vld [vmem:[%s1306_s1 + $0x10] sm:$0xff]  ;;  %918 = vset.pattern.permute.xlu0 %v1006_v4  ;;  %919 = vset.pattern.permute.xlu1 %v1006_v4 }
   0x2   :  { %v28_v1 = vld [vmem:[%s1306_s1] sm:$0xff]  ;;  %797 = vmatprep.subr.mxu0 %v27_v0  ;;  %v31_v5 = vld [vmem:[%s1306_s1 + $0x18] sm:$0xff]  ;;  %v57_v8 = vld [vmem:[%s1307_s2 + $0x68] sm:$0xff] }
   0x3   :  { %799 = vmatprep.mubr.msk.f32.mxu0 %vm140_vm0, %v28_v1  ;;  %798 = vmatpush3.msra.mxu0 %v27_v0  ;;  %v32_v6 = vld [vmem:[%s1306_s1 + $0x20] sm:$0xff]  ;;  %v59_v7 = vld [vmem:[%s1307_s2 + $0x78] sm:$0xff]  ;;  %v58_v9 = vld [vmem:[%s1307_s2 + $0x70] sm:$0xff] }
   0x4   :  { %800 = vmatmul.mubr.msk.f32.vlgmr.msra.gmra.mxu0 %vm140_vm0, %v29_v2  ;;  %137 = vperm.xlu0 %918, %v59_v7   ;;  %v33_v10 = vld [vmem:[%s1306_s1 + $0x28] sm:$0xff]  ;;  %v56_v11 = vld [vmem:[%s1307_s2 + $0x60] sm:$0xff]  ;;  %v34_v12 = vld [vmem:[%s1306_s1 + $0x30] sm:$0xff] }
   0x5   :  { %802 = vmatprep.mubr.msk.f32.mxu0 %vm140_vm0, %v30_v3  ;;  %127 = vperm.xlu1 %919, %v57_v8   ;;  %v55_v13 = vld [vmem:[%s1307_s2 + $0x58] sm:$0xff]  ;;  %v54_v15 = vld [vmem:[%s1307_s2 + $0x50] sm:$0xff]  ;;  %v36_v16 = vld [vmem:[%s1306_s1 + $0x40] sm:$0xff] }
   0x6   :  { %v35_v14 = vld [vmem:[%s1306_s1 + $0x38] sm:$0xff]  ;;  %v53_v17 = vld [vmem:[%s1307_s2 + $0x48] sm:$0xff]  ;;  %v52_v19 = vld [vmem:[%s1307_s2 + $0x40] sm:$0xff] }
   0x7   :  { %v37_v18 = vld [vmem:[%s1306_s1 + $0x48] sm:$0xff] }
   0x8   :  { %803 = vmatmul.mubr.msk.f32.gmra.mxu0 %vm140_vm0, %v31_v5  ;;  %132 = vperm.xlu0 %918, %v58_v9  }
   0x9   :  { %805 = vmatprep.mubr.msk.f32.mxu0 %vm140_vm0, %v32_v6  ;;  %122 = vperm.xlu1 %919, %v56_v11  }
   0xc   :  { %806 = vmatmul.mubr.msk.f32.gmra.mxu0 %vm140_vm0, %v33_v10  ;;  %117 = vperm.xlu0 %918, %v55_v13  }
   0xd   :  { %808 = vmatprep.mubr.msk.f32.mxu0 %vm140_vm0, %v34_v12  ;;  %112 = vperm.xlu1 %919, %v54_v15  }
  0x10   :  { %809 = vmatmul.mubr.msk.f32.gmra.mxu0 %vm140_vm0, %v35_v14 }
  0x11   :  { %811 = vmatprep.mubr.msk.f32.mxu0 %vm140_vm0, %v36_v16 }
  0x12   :  { %12 = vsyncpa [#allocation3], 0  ;;  %v38_v20 = vld [vmem:[%s1306_s1 + $0x50] sm:$0xff]  ;;  %107 = vperm.xlu0 %918, %v53_v17   ;;  %v51_v21 = vld [vmem:[%s1307_s2 + $0x38] sm:$0xff]  ;;  %102 = vperm.xlu1 %919, %v52_v19   ;;  %vm1008_vm1 = vmmov 0   ;;  %s1009_s27 = smov [#allocation2]  }
  0x13   :  { %v39_v22 = vld [vmem:[%s1306_s1 + $0x58] sm:$0xff]  ;;  %v50_v23 = vld [vmem:[%s1307_s2 + $0x30] sm:$0xff]  ;;  %v40_v24 = vld [vmem:[%s1306_s1 + $0x60] sm:$0xff]  ;;  %s707_s28 = sshll.u32 %s1009_s27, 4  ;;  %s708_s28 = int_to_ptr.vmem [resolvable:$true] %s707_s28 }
  0x14   :  { %812 = vmatmul.mubr.msk.f32.gmra.mxu0 %vm140_vm0, %v37_v18  ;;  %v49_v25 = vld [vmem:[%s1307_s2 + $0x28] sm:$0xff]  ;;  %v48_v27 = vld [vmem:[%s1307_s2 + $0x20] sm:$0xff]  ;;  %v42_v28 = vld [vmem:[%s1306_s1 + $0x70] sm:$0xff]  ;;  %s984_s29 = scalar_lea.vmem %s708_s28, 128  ;;  %p989_p1 = scmp.lt.s32.totalorder %s708_s28, %s708_s28 }
  0x15   :  { %814 = vmatprep.mubr.msk.f32.mxu0 %vm140_vm0, %v38_v20  ;;  %v41_v26 = vld [vmem:[%s1306_s1 + $0x68] sm:$0xff]  ;;  %v47_v29 = vld [vmem:[%s1307_s2 + $0x18] sm:$0xff]  ;;  %v46_v31 = vld [vmem:[%s1307_s2 + $0x10] sm:$0xff]  ;;  %p985_p0 = scmp.ne.s32.totalorder %s708_s28, %s984_s29  ;;  %p990_p2 = scmp.lt.s32.totalorder %s984_s29, %s984_s29 }
  0x16   :  { %97 = vperm.xlu0 %918, %v51_v21   ;;  %92 = vperm.xlu1 %919, %v50_v23   ;;  %v43_v30 = vld [vmem:[%s1306_s1 + $0x78] sm:$0xff]  ;;  %v45_v32 = vld [vmem:[%s1307_s2 + $0x8] sm:$0xff]  ;;  %v44_v33 = vld [vmem:[%s1307_s2] sm:$0xff] }
  0x17   :  { %v381_v34 = vld [vmem:[%s1309_s4 + $0x78] sm:$0xff]  ;;  %v380_v35 = vld [vmem:[%s1309_s4 + $0x70] sm:$0xff]  ;;  %v379_v36 = vld [vmem:[%s1309_s4 + $0x68] sm:$0xff]  ;;  %p991_p3 = por %p990_p2, %p989_p1 }
  0x18   :  { %815 = vmatmul.mubr.msk.f32.gmra.mxu0 %vm140_vm0, %v39_v22  ;;  %v378_v37 = vld [vmem:[%s1309_s4 + $0x60] sm:$0xff]  ;;  %v377_v38 = vld [vmem:[%s1309_s4 + $0x58] sm:$0xff]  ;;  %v376_v39 = vld [vmem:[%s1309_s4 + $0x50] sm:$0xff] }
  0x19   :  { %817 = vmatprep.mubr.msk.f32.mxu0 %vm140_vm0, %v40_v24  ;;  %v375_v40 = vld [vmem:[%s1309_s4 + $0x48] sm:$0xff]  ;;  %v374_v41 = vld [vmem:[%s1309_s4 + $0x40] sm:$0xff]  ;;  %v373_v42 = vld [vmem:[%s1309_s4 + $0x38] sm:$0xff]  ;;  %p992_p4 = pnand %p991_p3, %p985_p0 }
  0x1a   :  { %87 = vperm.xlu0 %918, %v49_v25   ;;  %82 = vperm.xlu1 %919, %v48_v27   ;;  %v372_v43 = vld [vmem:[%s1309_s4 + $0x30] sm:$0xff]  ;;  %v371_v44 = vld [vmem:[%s1309_s4 + $0x28] sm:$0xff]  ;;  %v370_v45 = vld [vmem:[%s1309_s4 + $0x20] sm:$0xff] }
  0x1b   :  { %v369_v46 = vld [vmem:[%s1309_s4 + $0x18] sm:$0xff]  ;;  %v368_v47 = vld [vmem:[%s1309_s4 + $0x10] sm:$0xff]  ;;  %v367_v48 = vld [vmem:[%s1309_s4 + $0x8] sm:$0xff] }
  0x1c   :  { %818 = vmatmul.mubr.msk.f32.gmra.mxu0 %vm140_vm0, %v41_v26  ;;  %v366_v49 = vld [vmem:[%s1309_s4] sm:$0xff] }
  0x1d   :  { %820 = vmatprep.mubr.msk.f32.mxu0 %vm140_vm0, %v42_v28  ;;  %v624_v50 = vld [vmem:[%s1311_s6] sm:$0xff] }
  0x1e   :  { %77 = vperm.xlu0 %918, %v47_v29   ;;  %72 = vperm.xlu1 %919, %v46_v31   ;;  %v350_v51 = vld [vmem:[%s1308_s3] sm:$0xff] }
  0x1f   :  { %855 = vmatprep.mubr.f32.mxu1 %v350_v51 }
  0x20   :  { %821 = vmatmul.mubr.msk.f32.gmra.mxu0 %vm140_vm0, %v43_v30 }
  0x22   :  { %67 = vperm.xlu0 %918, %v45_v32   ;;  %62 = vperm.xlu1 %919, %v44_v33  }
  0x26   :  { %459 = vperm.xlu0 %918, %v381_v34   ;;  %454 = vperm.xlu1 %919, %v380_v35  }
  0x2a   :  { %449 = vperm.xlu0 %918, %v379_v36   ;;  %444 = vperm.xlu1 %919, %v378_v37  }
  0x2e   :  { %439 = vperm.xlu0 %918, %v377_v38   ;;  %434 = vperm.xlu1 %919, %v376_v39  }
  0x32   :  { %429 = vperm.xlu0 %918, %v375_v40   ;;  %424 = vperm.xlu1 %919, %v374_v41  }
  0x36   :  { %419 = vperm.xlu0 %918, %v373_v42   ;;  %414 = vperm.xlu1 %919, %v372_v43  }
  0x3a   :  { %409 = vperm.xlu0 %918, %v371_v44   ;;  %404 = vperm.xlu1 %919, %v370_v45  }
  0x3e   :  { %399 = vperm.xlu0 %918, %v369_v46   ;;  %394 = vperm.xlu1 %919, %v368_v47  }
  0x42   :  { %389 = vperm.xlu0 %918, %v367_v48   ;;  %384 = vperm.xlu1 %919, %v366_v49  }
  0x46   :  { %627 = vperm.xlu0 %918, %v624_v50  }
  0x7f   :  { %v138_v58 = vpop.permute.xlu0 %137 }
  0x80   :  { %v128_v60 = vpop.permute.xlu1 %127 }
  0x83   :  { %v133_v63 = vpop.permute.xlu0 %132 }
  0x84   :  { %v123_v1 = vpop.permute.xlu1 %122 }
  0x87   :  { %v118_v4 = vpop.permute.xlu0 %117 }
  0x88   :  { %v113_v6 = vpop.permute.xlu1 %112 }
  0x8d   :  { %v108_v10 = vpop.permute.xlu0 %107  ;;  %v103_v14 = vpop.permute.xlu1 %102 }
  0x91   :  { %v98_v17 = vpop.permute.xlu0 %97  ;;  %v93_v19 = vpop.permute.xlu1 %92 }
  0x95   :  { %v88_v22 = vpop.permute.xlu0 %87  ;;  %v83_v25 = vpop.permute.xlu1 %82 }
  0x99   :  { %v78_v30 = vpop.permute.xlu0 %77  ;;  %v73_v33 = vpop.permute.xlu1 %72 }
  0x9d   :  { %v68_v38 = vpop.permute.xlu0 %67  ;;  %v63_v41 = vpop.permute.xlu1 %62 }
  0xc4   :  { %v1219_v52 = vpop.f32.mrf.mxu0 }
  0xc5   :  { %v261_v39 = vadd.f32 %v1219_v52, %v68_v38  ;;  %v351_v52 = vld [vmem:[%s1308_s3 + $0x8] sm:$0xff] }
  0xc6   :  { %v1221_v53 = vpop.f32.mrf.mxu0 }
  0xc7   :  { %v256_v42 = vadd.f32 %v1221_v53, %v63_v41  ;;  %v352_v53 = vld [vmem:[%s1308_s3 + $0x10] sm:$0xff] }
  0xc8   :  { %v804_v54 = vpop.f32.mrf.mxu0 }
  0xc9   :  { %v271_v34 = vadd.f32 %v804_v54, %v78_v30  ;;  %v353_v54 = vld [vmem:[%s1308_s3 + $0x18] sm:$0xff] }
  0xca   :  { %v1223_v55 = vpop.f32.mrf.mxu0 }
  0xcb   :  { %v266_v36 = vadd.f32 %v1223_v55, %v73_v33  ;;  %v354_v55 = vld [vmem:[%s1308_s3 + $0x20] sm:$0xff] }
  0xcc   :  { %v807_v56 = vpop.f32.mrf.mxu0 }
  0xcd   :  { %v281_v28 = vadd.f32 %v807_v56, %v88_v22  ;;  %v355_v56 = vld [vmem:[%s1308_s3 + $0x28] sm:$0xff] }
  0xce   :  { %v275_v57 = vpop.f32.mrf.mxu0 }
  0xcf   :  { %v276_v31 = vadd.f32 %v275_v57, %v83_v25  ;;  %v356_v57 = vld [vmem:[%s1308_s3 + $0x30] sm:$0xff] }
  0xd0   :  { %v810_v59 = vpop.f32.mrf.mxu0 }
  0xd1   :  { %v291_v23 = vadd.f32 %v810_v59, %v98_v17  ;;  %v358_v59 = vld [vmem:[%s1308_s3 + $0x40] sm:$0xff] }
  0xd2   :  { %v285_v61 = vpop.f32.mrf.mxu0 }
  0xd3   :  { %v286_v26 = vadd.f32 %v285_v61, %v93_v19  ;;  %v360_v61 = vld [vmem:[%s1308_s3 + $0x50] sm:$0xff] }
  0xd4   :  { %v813_v62 = vpop.f32.mrf.mxu0 }
  0xd5   :  { %v301_v20 = vadd.f32 %v813_v62, %v108_v10  ;;  %v361_v62 = vld [vmem:[%s1308_s3 + $0x58] sm:$0xff]  ;;  %v460_v10 = vpop.permute.xlu0 %459 }
  0xd6   :  { %v295_v0 = vpop.f32.mrf.mxu0 }
  0xd7   :  { %v296_v21 = vadd.f32 %v295_v0, %v103_v14  ;;  %v363_v0 = vld [vmem:[%s1308_s3 + $0x68] sm:$0xff] }
  0xd8   :  { %v816_v2 = vpop.f32.mrf.mxu0 }
  0xd9   :  { %v311_v16 = vadd.f32 %v816_v2, %v118_v4  ;;  %v365_v2 = vld [vmem:[%s1308_s3 + $0x78] sm:$0xff] }
  0xda   :  { %v305_v3 = vpop.f32.mrf.mxu0 }
  0xdb   :  { %v306_v18 = vadd.f32 %v305_v3, %v113_v6  ;;  %v1007_v3 = vmov 0.0  }
  0xdc   :  { %v819_v5 = vpop.f32.mrf.mxu0  ;;  %879 = vmatprep.subr.mxu0 %v1007_v3  ;;  %911 = vmatprep.mubr.msk.f32.mxu0 %vm1008_vm1, %v1007_v3 }
  0xdd   :  { %v321_v12 = vadd.f32 %v819_v5, %v128_v60  ;;  %v359_v60 = vld [vmem:[%s1308_s3 + $0x48] sm:$0xff] }
  0xde   :  { %v315_v7 = vpop.f32.mrf.mxu0 }
  0xdf   :  { %v316_v15 = vadd.f32 %v315_v7, %v123_v1  ;;  %v364_v1 = vld [vmem:[%s1308_s3 + $0x70] sm:$0xff] }
  0xe0   :  { %v822_v8 = vpop.f32.mrf.mxu0 }
  0xe1   :  { %v331_v9 = vadd.f32 %v822_v8, %v138_v58  ;;  %v357_v58 = vld [vmem:[%s1308_s3 + $0x38] sm:$0xff] }
  0xe2   :  { %v325_v11 = vpop.f32.mrf.mxu0 }
  0xe3   :  { %920 = vtanh.f32 %v331_v9  ;;  %v326_v13 = vadd.f32 %v325_v11, %v133_v63  ;;  %v362_v63 = vld [vmem:[%s1308_s3 + $0x60] sm:$0xff] }
  0xe5   :  { %922 = vtanh.f32 %v326_v13 }
  0xe6   :  { %924 = vtanh.f32 %v321_v12  ;;  %v455_v12 = vpop.permute.xlu1 %454 }
  0xe7   :  { %926 = vtanh.f32 %v316_v15  ;;  %v450_v15 = vpop.permute.xlu0 %449 }
  0xe8   :  { %928 = vtanh.f32 %v311_v16 }
  0xe9   :  { %930 = vtanh.f32 %v306_v18 }
  0xea   :  { %932 = vtanh.f32 %v301_v20  ;;  %v445_v17 = vpop.permute.xlu1 %444 }
  0xeb   :  { %934 = vtanh.f32 %v296_v21  ;;  %v440_v20 = vpop.permute.xlu0 %439 }
  0xec   :  { %936 = vtanh.f32 %v291_v23 }
  0xed   :  { %938 = vtanh.f32 %v286_v26 }
  0xee   :  { %940 = vtanh.f32 %v281_v28  ;;  %v435_v22 = vpop.permute.xlu1 %434 }
  0xef   :  { %942 = vtanh.f32 %v276_v31  ;;  %v430_v26 = vpop.permute.xlu0 %429 }
  0xf0   :  { %v921_v24 = vpop.eup %920  ;;  %944 = vtanh.f32 %v271_v34 }
  0xf1   :  { %823 = vmatprep.subr.mxu1 %v921_v24  ;;  %946 = vtanh.f32 %v266_v36 }
  0xf2   :  { %v923_v27 = vpop.eup %922  ;;  %824 = vmatpush3.msra.mxu1 %v921_v24  ;;  %948 = vtanh.f32 %v261_v39  ;;  %v425_v30 = vpop.permute.xlu1 %424 }
  0xf3   :  { %825 = vmatprep.subr.mxu1 %v923_v27  ;;  %v925_v29 = vpop.eup %924  ;;  %950 = vtanh.f32 %v256_v42  ;;  %v420_v33 = vpop.permute.xlu0 %419 }
  0xf4   :  { %826 = vmatpush3.msra.mxu1 %v923_v27  ;;  %v927_v32 = vpop.eup %926 }
  0xf5   :  { %827 = vmatprep.subr.mxu1 %v925_v29  ;;  %v929_v35 = vpop.eup %928 }
  0xf6   :  { %828 = vmatpush3.msra.mxu1 %v925_v29  ;;  %v931_v37 = vpop.eup %930 }
  0xf7   :  { %829 = vmatprep.subr.mxu1 %v927_v32  ;;  %v933_v40 = vpop.eup %932  ;;  %v410_v38 = vpop.permute.xlu0 %409 }
  0xf8   :  { %830 = vmatpush3.msra.mxu1 %v927_v32  ;;  %v935_v43 = vpop.eup %934 }
  0xf9   :  { %831 = vmatprep.subr.mxu1 %v929_v35  ;;  %v937_v44 = vpop.eup %936 }
  0xfa   :  { %832 = vmatpush3.msra.mxu1 %v929_v35  ;;  %v939_v45 = vpop.eup %938  ;;  %v415_v35 = vpop.permute.xlu1 %414 }
  0xfb   :  { %833 = vmatprep.subr.mxu1 %v931_v37  ;;  %v941_v46 = vpop.eup %940 }
  0xfc   :  { %834 = vmatpush3.msra.mxu1 %v931_v37  ;;  %v943_v47 = vpop.eup %942 }
  0xfd   :  { %835 = vmatprep.subr.mxu1 %v933_v40  ;;  %v945_v48 = vpop.eup %944 }
  0xfe   :  { %836 = vmatpush3.msra.mxu1 %v933_v40  ;;  %v947_v49 = vpop.eup %946  ;;  %v405_v41 = vpop.permute.xlu1 %404 }
  0xff   :  { %837 = vmatprep.subr.mxu1 %v935_v43  ;;  %v949_v50 = vpop.eup %948 }
 0x100   :  { %838 = vmatpush3.msra.mxu1 %v935_v43  ;;  %v951_v51 = vpop.eup %950 }
 0x101   :  { %839 = vmatprep.subr.mxu1 %v937_v44 }
 0x102   :  { %840 = vmatpush3.msra.mxu1 %v937_v44 }
 0x103   :  { %841 = vmatprep.subr.mxu1 %v939_v45 }
 0x104   :  { %842 = vmatpush3.msra.mxu1 %v939_v45 }
 0x105   :  { %843 = vmatprep.subr.mxu1 %v941_v46 }
 0x106   :  { %844 = vmatpush3.msra.mxu1 %v941_v46  ;;  %v400_v46 = vpop.permute.xlu0 %399 }
 0x107   :  { %845 = vmatprep.subr.mxu1 %v943_v47 }
 0x108   :  { %846 = vmatpush3.msra.mxu1 %v943_v47 }
 0x109   :  { %847 = vmatprep.subr.mxu1 %v945_v48 }
 0x10a   :  { %848 = vmatpush3.msra.mxu1 %v945_v48 }
 0x10b   :  { %849 = vmatprep.subr.mxu1 %v947_v49 }
 0x10c   :  { %850 = vmatpush3.msra.mxu1 %v947_v49  ;;  %v395_v49 = vpop.permute.xlu1 %394 }
 0x10d   :  { %851 = vmatprep.subr.mxu1 %v949_v50 }
 0x10e   :  { %852 = vmatpush3.msra.mxu1 %v949_v50 }
 0x10f   :  { %853 = vmatprep.subr.mxu1 %v951_v51 }
 0x110   :  { %854 = vmatpush3.msra.mxu1 %v951_v51 }
 0x111   :  { %856 = vmatmul.mubr.f32.vlgmr.msra.gmra.mxu1 %v351_v52 }
 0x112   :  { %858 = vmatprep.mubr.f32.mxu1 %v352_v53 }
 0x115   :  { %859 = vmatmul.mubr.f32.gmra.mxu1 %v353_v54  ;;  %v390_v54 = vpop.permute.xlu0 %389 }
 0x116   :  { %861 = vmatprep.mubr.f32.mxu1 %v354_v55 }
 0x119   :  { %862 = vmatmul.mubr.f32.gmra.mxu1 %v355_v56 }
 0x11a   :  { %864 = vmatprep.mubr.f32.mxu1 %v356_v57  ;;  %v385_v57 = vpop.permute.xlu1 %384 }
 0x11d   :  { %865 = vmatmul.mubr.f32.gmra.mxu1 %v357_v58 }
 0x11e   :  { %867 = vmatprep.mubr.f32.mxu1 %v358_v59 }
 0x121   :  { %868 = vmatmul.mubr.f32.gmra.mxu1 %v359_v60 }
 0x122   :  { %870 = vmatprep.mubr.f32.mxu1 %v360_v61 }
 0x125   :  { %871 = vmatmul.mubr.f32.gmra.mxu1 %v361_v62 }
 0x126   :  { %873 = vmatprep.mubr.f32.mxu1 %v362_v63 }
 0x129   :  { %874 = vmatmul.mubr.f32.gmra.mxu1 %v363_v0 }
 0x12a   :  { %876 = vmatprep.mubr.f32.mxu1 %v364_v1 }
 0x12d   :  { %877 = vmatmul.mubr.f32.gmra.mxu1 %v365_v2 }
 0x1d1   :  { %v1275_v4 = vpop.f32.mrf.mxu1 }
 0x1d2   :  { %v534_v55 = vadd.f32 %v1275_v4, %v390_v54  ;;  %v623_v4 = vld [vmem:[%s1310_s5] sm:$0xff] }
 0x1d3   :  { %v1277_v5 = vpop.f32.mrf.mxu1 }
 0x1d4   :  { %v529_v58 = vadd.f32 %v1277_v5, %v385_v57 }
 0x1d5   :  { %v860_v6 = vpop.f32.mrf.mxu1 }
 0x1d6   :  { %v544_v50 = vadd.f32 %v860_v6, %v400_v46  ;;  %v628_v6 = vpop.permute.xlu0 %627 }
 0x1d7   :  { %v1279_v7 = vpop.f32.mrf.mxu1 }
 0x1d8   :  { %v539_v52 = vadd.f32 %v1279_v7, %v395_v49 }
 0x1d9   :  { %v863_v8 = vpop.f32.mrf.mxu1 }
 0x1da   :  { %v554_v44 = vadd.f32 %v863_v8, %v410_v38 }
 0x1db   :  { %v548_v9 = vpop.f32.mrf.mxu1 }
 0x1dc   :  { %v549_v47 = vadd.f32 %v548_v9, %v405_v41 }
 0x1dd   :  { %v866_v11 = vpop.f32.mrf.mxu1 }
 0x1de   :  { %v564_v39 = vadd.f32 %v866_v11, %v420_v33 }
 0x1df   :  { %v558_v13 = vpop.f32.mrf.mxu1 }
 0x1e0   :  { %v559_v42 = vadd.f32 %v558_v13, %v415_v35 }
 0x1e1   :  { %v869_v14 = vpop.f32.mrf.mxu1 }
 0x1e2   :  { %v574_v36 = vadd.f32 %v869_v14, %v430_v26 }
 0x1e3   :  { %v568_v16 = vpop.f32.mrf.mxu1 }
 0x1e4   :  { %v569_v37 = vadd.f32 %v568_v16, %v425_v30 }
 0x1e5   :  { %v872_v18 = vpop.f32.mrf.mxu1 }
 0x1e6   :  { %v584_v32 = vadd.f32 %v872_v18, %v440_v20 }
 0x1e7   :  { %v578_v19 = vpop.f32.mrf.mxu1 }
 0x1e8   :  { %v579_v34 = vadd.f32 %v578_v19, %v435_v22 }
 0x1e9   :  { %v875_v21 = vpop.f32.mrf.mxu1 }
 0x1ea   :  { %v594_v28 = vadd.f32 %v875_v21, %v450_v15 }
 0x1eb   :  { %v588_v23 = vpop.f32.mrf.mxu1 }
 0x1ec   :  { %v589_v31 = vadd.f32 %v588_v23, %v445_v17 }
 0x1ed   :  { %v878_v24 = vpop.f32.mrf.mxu1 }
 0x1ee   :  { %v604_v25 = vadd.f32 %v878_v24, %v460_v10 }
 0x1ef   :  { %v598_v27 = vpop.f32.mrf.mxu1 }
 0x1f0   :  { %952 = vtanh.f32 %v604_v25  ;;  %v599_v29 = vadd.f32 %v598_v27, %v455_v12 }
 0x1f2   :  { %954 = vtanh.f32 %v599_v29 }
 0x1f3   :  { %956 = vtanh.f32 %v594_v28 }
 0x1f4   :  { %958 = vtanh.f32 %v589_v31 }
 0x1f5   :  { %960 = vtanh.f32 %v584_v32 }
 0x1f6   :  { %962 = vtanh.f32 %v579_v34 }
 0x1f7   :  { %964 = vtanh.f32 %v574_v36 }
 0x1f8   :  { %966 = vtanh.f32 %v569_v37 }
 0x1f9   :  { %968 = vtanh.f32 %v564_v39 }
 0x1fa   :  { %970 = vtanh.f32 %v559_v42 }
 0x1fb   :  { %972 = vtanh.f32 %v554_v44 }
 0x1fc   :  { %974 = vtanh.f32 %v549_v47 }
 0x1fd   :  { %v953_v40 = vpop.eup %952  ;;  %976 = vtanh.f32 %v544_v50 }
 0x1fe   :  { %880 = vmatpush3.msra.mxu0 %v953_v40  ;;  %978 = vtanh.f32 %v539_v52 }
 0x1ff   :  { %v955_v43 = vpop.eup %954  ;;  %881 = vmatprep.subr.mxu0 %v1007_v3  ;;  %980 = vtanh.f32 %v534_v55 }
 0x200   :  { %882 = vmatpush3.msra.mxu0 %v955_v43  ;;  %v957_v45 = vpop.eup %956  ;;  %982 = vtanh.f32 %v529_v58 }
 0x201   :  { %883 = vmatprep.subr.mxu0 %v1007_v3  ;;  %v959_v48 = vpop.eup %958 }
 0x202   :  { %884 = vmatpush3.msra.mxu0 %v957_v45  ;;  %v961_v51 = vpop.eup %960 }
 0x203   :  { %885 = vmatprep.subr.mxu0 %v1007_v3  ;;  %v963_v53 = vpop.eup %962 }
 0x204   :  { %886 = vmatpush3.msra.mxu0 %v959_v48  ;;  %v965_v56 = vpop.eup %964 }
 0x205   :  { %887 = vmatprep.subr.mxu0 %v1007_v3  ;;  %v967_v59 = vpop.eup %966 }
 0x206   :  { %888 = vmatpush3.msra.mxu0 %v961_v51  ;;  %v969_v60 = vpop.eup %968 }
 0x207   :  { %889 = vmatprep.subr.mxu0 %v1007_v3  ;;  %v971_v61 = vpop.eup %970 }
 0x208   :  { %890 = vmatpush3.msra.mxu0 %v963_v53  ;;  %v973_v62 = vpop.eup %972 }
 0x209   :  { %891 = vmatprep.subr.mxu0 %v1007_v3  ;;  %v975_v63 = vpop.eup %974 }
 0x20a   :  { %892 = vmatpush3.msra.mxu0 %v965_v56  ;;  %v977_v0 = vpop.eup %976 }
 0x20b   :  { %893 = vmatprep.subr.mxu0 %v1007_v3  ;;  %v979_v1 = vpop.eup %978 }
 0x20c   :  { %894 = vmatpush3.msra.mxu0 %v967_v59  ;;  %v981_v2 = vpop.eup %980 }
 0x20d   :  { %895 = vmatprep.subr.mxu0 %v1007_v3  ;;  %v983_v5 = vpop.eup %982 }
 0x20e   :  { %896 = vmatpush3.msra.mxu0 %v969_v60 }
 0x20f   :  { %897 = vmatprep.subr.mxu0 %v1007_v3 }
 0x210   :  { %898 = vmatpush3.msra.mxu0 %v971_v61 }
 0x211   :  { %899 = vmatprep.subr.mxu0 %v1007_v3 }
 0x212   :  { %900 = vmatpush3.msra.mxu0 %v973_v62 }
 0x213   :  { %901 = vmatprep.subr.mxu0 %v1007_v3 }
 0x214   :  { %902 = vmatpush3.msra.mxu0 %v975_v63 }
 0x215   :  { %903 = vmatprep.subr.mxu0 %v1007_v3 }
 0x216   :  { %904 = vmatpush3.msra.mxu0 %v977_v0 }
 0x217   :  { %905 = vmatprep.subr.mxu0 %v1007_v3 }
 0x218   :  { %906 = vmatpush3.msra.mxu0 %v979_v1 }
 0x219   :  { %907 = vmatprep.subr.mxu0 %v1007_v3 }
 0x21a   :  { %908 = vmatpush3.msra.mxu0 %v981_v2 }
 0x21b   :  { %909 = vmatprep.subr.mxu0 %v1007_v3 }
 0x21c   :  { %910 = vmatpush3.msra.mxu0 %v983_v5 }
 0x21d   :  { %912 = vmatmul.mubr.f32.vlgmr.msra.gmra.mxu0 %v623_v4 }
 0x2dd   :  { %v696_v7 = vpop.f32.mrf.mxu0 }
 0x2de   :  { %v697_v8 = vadd.f32 %v696_v7, %v628_v6 }
 0x2df   :  { %v913_v9 = vpop.f32.mrf.mxu0 }
 0x2e0   :  { %700 = vst [vmem:[#allocation2] sm:$0xff] %v697_v8 }
 0x2e1   :  { %995 = shalt.err (!%p992_p4)
}
 0x2e2   :  { %710 = dma.vmem_to_hbm [thread:$0]  %s708_s28, 128, %s1312_s7, [#allocation3]  }
 0x2e3   :  { %1004 = dma.done.wait [#allocation3], 128  }
 0x2e4   :  { %1005 = vsyncadd [#allocation3], 4294967168 }
 0x2e5   :  { %714 = vsyncpa [#allocation3], 1 }

</bundles_post_ra>
